<compile_context>
chip_gen: v7x
topology: tpu7x:2x2x1
jax: 0.10.0
libtpu: 0.0.40
codegen_flags: <defaults>
</compile_context>

<pallas_src>
import jax
import jax.numpy as jnp
from jax.experimental import pallas as pl
from jax.experimental.pallas import tpu as pltpu

LANE = 128            # lane-dense last dim (multiple of 128 -> unmasked vld/vst)
ROW_ALIGN = 8         # sublane alignment
MAX_TILE_ROWS = 4096  # 4096 * 128 * 4 B = 2 MiB per tile; 2 bufs x (in + out) = 8 MiB VMEM


def _round_up(x, m):
    return ((x + m - 1) // m) * m


def _gather_frames_kernel(src_ref, x_ref, o_ref):
    # src_ref lives in SMEM (scalar prefetch); the gather itself happens in the
    # BlockSpec index_map, so the body is a pure VMEM tile copy.
    del src_ref
    o_ref[...] = x_ref[...]


def _gather_frames(frames_flat, src_idx, r_tile):
    """frames_flat: (T, R, LANE); src_idx: (T,) int32 -> gathered (T, R, LANE)."""
    T, R, _ = frames_flat.shape
    nbytes = frames_flat.size * frames_flat.dtype.itemsize
    return pl.pallas_call(
        _gather_frames_kernel,
        out_shape=jax.ShapeDtypeStruct(frames_flat.shape, frames_flat.dtype),
        grid_spec=pltpu.PrefetchScalarGridSpec(
            num_scalar_prefetch=1,
            grid=(T, R // r_tile),
            in_specs=[pl.BlockSpec((1, r_tile, LANE),
                                   lambda t, j, src: (src[t], j, 0))],
            out_specs=pl.BlockSpec((1, r_tile, LANE),
                                   lambda t, j, src: (t, j, 0)),
        ),
        compiler_params=pltpu.CompilerParams(
            dimension_semantics=("parallel", "parallel")),
        cost_estimate=pl.CostEstimate(flops=0, transcendentals=0,
                                      bytes_accessed=2 * nbytes),
    )(src_idx, frames_flat)


def sample_src_indices(key, num_frames, drop_prob):
    """JAX analogue of the per-frame `random` draws in DropFrame.forward."""
    k_drop, k_dir = jax.random.split(key)
    idx = jnp.arange(num_frames, dtype=jnp.int32)
    drop = jax.random.uniform(k_drop, (num_frames,)) < drop_prob
    direction = jnp.where(jax.random.uniform(k_dir, (num_frames,)) < 0.5, -1, 1)
    neighbour = jnp.mod(idx + direction, num_frames).astype(jnp.int32)
    return jnp.where(drop, neighbour, idx)


def drop_frame_forward(frames, mask=None, drop_prob=None, *, key=None,
                       src_indices=None, default_drop_prob=0.125):
    """Mirror of DropFrame.forward.  Randomness comes from `key`, or pass
    precomputed `src_indices` directly.  Returns (output, mask)."""
    T, C, H, W = frames.shape
    if src_indices is None:
        if drop_prob is None:
            drop_prob = default_drop_prob
        if key is None:
            key = jax.random.PRNGKey(0)
        src_indices = sample_src_indices(key, T, drop_prob)
    src_indices = src_indices.astype(jnp.int32)

    # Lane-dense, (8,128)-aligned per-frame layout: (T, R, LANE).
    P = C * H * W
    R = _round_up(pl.cdiv(P, LANE), ROW_ALIGN)
    r_tile = min(MAX_TILE_ROWS, R)
    R = _round_up(R, r_tile)
    P_pad = R * LANE

    flat = frames.reshape(T, P)
    if P_pad != P:
        flat = jnp.pad(flat, ((0, 0), (0, P_pad - P)))
    flat = flat.reshape(T, R, LANE)

    out = _gather_frames(flat, src_indices, r_tile)
    out = out.reshape(T, P_pad)[:, :P].reshape(T, C, H, W)
    return out, mask


if __name__ == "__main__":
    key = jax.random.PRNGKey(0)
    k_data, k_drop = jax.random.split(key)

    # small video: T=8 frames, C=3 channels, 16x16 spatial
    T, C, H, W = 8, 3, 16, 16
    frames = jax.random.uniform(k_data, (T, C, H, W), dtype=jnp.float32)
    mask = jnp.ones((T, 1, H, W), dtype=jnp.float32)

    drop_prob = 0.5  # high enough that some frames are actually replaced
    out, mask_out = drop_frame_forward(frames, mask=mask, drop_prob=drop_prob,
                                       key=k_drop)
    out = jax.block_until_ready(out)

    # pure-JAX reference: identical source indices, plain gather along T
    src = sample_src_indices(k_drop, T, drop_prob)
    ref = jnp.take(frames, src, axis=0)

    assert out.shape == frames.shape
    assert mask_out is not None and mask_out.shape == mask.shape
    assert bool(jnp.array_equal(out, ref))

    print("KERNEL_OK")
</pallas_src>

<mosaic_0001>
module attributes {stable_mosaic.version = 11 : i64} {
  func.func @_gather_frames_kernel(%arg0: i32, %arg1: i32, %arg2: memref<8xi32, #tpu.memory_space<smem>>, %arg3: memref<1x8x128xf32, #tpu.memory_space<vmem>>, %arg4: memref<1x8x128xf32, #tpu.memory_space<vmem>>) attributes {dimension_semantics = [#tpu.dimension_semantics<parallel>, #tpu.dimension_semantics<parallel>], iteration_bounds = array<i64: 8, 1>, scalar_prefetch = 1 : i64, scratch_operands = 0 : i64, tpu.core_type = #tpu.core_type<tc>, window_params = [{transform_indices = @transform_0, window_bounds = array<i64: 1, 8, 128>}, {transform_indices = @transform_1, window_bounds = array<i64: 1, 8, 128>}]} {
    %c0 = arith.constant 0 : index
    %c0_0 = arith.constant 0 : index
    %c0_1 = arith.constant 0 : index
    %0 = vector.load %arg3[%c0, %c0_0, %c0_1] : memref<1x8x128xf32, #tpu.memory_space<vmem>>, vector<1x8x128xf32>
    %c0_2 = arith.constant 0 : index
    %c0_3 = arith.constant 0 : index
    %c0_4 = arith.constant 0 : index
    %1 = vector.load %arg4[%c0_2, %c0_3, %c0_4] : memref<1x8x128xf32, #tpu.memory_space<vmem>>, vector<1x8x128xf32>
    tpu.vector_store %arg4[%c0_2, %c0_3, %c0_4], %0 {strides = array<i32>} : memref<1x8x128xf32, #tpu.memory_space<vmem>>, vector<1x8x128xf32>,
    return
  }
  func.func @transform_0(%arg0: i32, %arg1: i32, %arg2: memref<8xi32, #tpu.memory_space<smem>>) -> (i32, i32, i32) {
    %0 = arith.index_cast %arg0 : i32 to index
    %1 = memref.load %arg2[%0] : memref<8xi32, #tpu.memory_space<smem>>
    %c0_i32 = arith.constant 0 : i32
    %c0_i32_0 = arith.constant 0 : i32
    return %1, %arg1, %c0_i32 : i32, i32, i32
  }
  func.func @transform_1(%arg0: i32, %arg1: i32, %arg2: memref<8xi32, #tpu.memory_space<smem>>) -> (i32, i32, i32) {
    %c0_i32 = arith.constant 0 : i32
    %c0_i32_0 = arith.constant 0 : i32
    return %arg0, %arg1, %c0_i32 : i32, i32, i32
  }
}

</mosaic_0001>

<bundles_post_ra>
// kernel: tpu_custom_call.1
= control target key start
LH: loop header
LB: loop body
LE: loop exit
PB: predicated region body
PF: predicated region fallthrough
CT: control target
= control target key end

     0   :  { %s742_s0 = inlined_call_operand.hbm [shape: s32[8], index: 0, kind: input, shape index: {}]   ;;  %s743_s1 = inlined_call_operand.hbm [shape: f32[8,8,128], index: 1, kind: input, shape index: {}]   ;;  %s744_s2 = inlined_call_operand.hbm [shape: f32[8,8,128], index: 2, kind: output, shape index: {}]  }
   0x1   :  { %s359_s11 = scalar_lea.hbm %s742_s0, 16 }
   0x2   :  { %p360_p0 = scmp.ne.s32.totalorder %s742_s0, %s359_s11  ;;  %p363_p1 = scmp.lt.u32.totalorder %s359_s11, %s742_s0 }
   0x4   :  { %p365_p2 = pnand %p363_p1, %p360_p0 }
   0x6   :  { %368 = shalt.err (!%p365_p2)  }
   0x7   :  { %s509_s16 = smov [#allocation3]  }
   0x8   :  { %8 = dma.hbm_to_smem %s742_s0, 16, %s509_s16, [#allocation2] }
   0x9   :  { %463 = dma.done.wait [#allocation2], 16 }
   0xa   :  { %464 = vsyncadd [#allocation2], 4294967280 }
   0xb   :  { %10 = sfence }
   0xc   :  { %11 = vsyncpa [#allocation5], 0 }
   0xd   :  { %13 = vsyncpa [#allocation5 + $0x1], 0 }
   0xe   :  { %14 = vsyncpa [#allocation6], 0 }
   0xf   :  { %16 = vsyncpa [#allocation6 + $0x1], 0  ;;  %s539_s19 = smov 0   ;;  %s541_s20 = smov 0  }
  0x10   :  { %s543_s21 = smov 0   ;;  %s545_s22 = smov 0  }
  0x11   :  { %s547_s23 = smov 0   ;;  %s549_s24 = smov 0  }
  0x12   :  { %s551_s0 = smov 0   ;;  %s553_s25 = smov 0  }
  0x13   :  { %s555_s26 = smov 0  }
  0x14 LB: > { %s255_s27 = sadd.s32 4294967295, %s507_s26   ;;  %s256_s28 = sadd.s32 4294967294, %s507_s26   ;;  %s507_s26 = sphi %s555_s26, %s22_s26   ;;  %s503_s25 = sphi %s553_s25, %s763_s25   ;;  %s499_s0 = sphi %s551_s0, %s762_s0   ;;  %s495_s24 = sphi %s549_s24, %s761_s24   ;;  %s491_s23 = sphi %s547_s23, %s760_s23   ;;  %s487_s22 = sphi %s545_s22, %s759_s22   ;;  %s483_s21 = sphi %s543_s21, %s758_s21   ;;  %s479_s20 = sphi %s541_s20, %s757_s20   ;;  %s475_s19 = sphi %s539_s19, %s756_s19  }
  0x15   : > { %s34_s29 = sadd.s32 1, %s503_s25  ;;  %s38_s30 = sld [smem:[#allocation3 + %s503_s25]] }
  0x16   : > { %p36_p3 = scmp.ge.s32.totalorder %s34_s29, 8  ;;  %s45_s3 = sadd.s32 1, %s495_s24 }
  0x17   : > { %p52_p4 = scmp.ne.s32.totalorder %s495_s24, %s491_s23  ;;  %p53_p5 = scmp.eq.s32.totalorder %s507_s26, 0 }
  0x18   : > { %s765_s29 = smov (%p36_p3, %s34_s29), 0  ;;  %p58_p7 = scmp.ne.s32.totalorder %s491_s23, %s487_s22 }
  0x19   : > { %p592_p6 = por %p53_p5, %p52_p4  ;;  %s39_s5 = sld [smem:[#allocation3 + %s765_s29]] }
  0x1a   : > { %p59_p8 = scmp.eq.s32.totalorder %s255_s27, 0  ;;  %s68_s6 = ssub.s32 %s503_s25, %s765_s29 }
  0x1b   : > { %s73_s7 = sadd.s32 1, %s483_s21  ;;  %p71_p10 = scmp.eq.s32.totalorder %s68_s6, 0 }
  0x1c   : > { %p601_p9 = por %p59_p8, %p58_p7  ;;  %p83_p11 = scmp.ne.s32.totalorder %s483_s21, %s479_s20 }
  0x1d   : > { %p84_p12 = scmp.eq.s32.totalorder %s255_s27, 7  ;;  %p89_p0 = scmp.ne.s32.totalorder %s479_s20, %s475_s19 }
  0x1e   : > { %s748_s8 = scalar_select %p601_p9, 1, 0 }
  0x1f   : > { %s608_s9 = scalar_select %p71_p10, %s483_s21, %s73_s7  }
  0x20   : > { %p610_p13 = por %p84_p12, %p83_p11  ;;  %s40_s11 = ssub.s32 %s38_s30, %s39_s5 }
  0x21   : > { %p90_p1 = scmp.eq.s32.totalorder %s256_s28, 7  ;;  %p43_p2 = scmp.eq.s32.totalorder %s40_s11, 0 }
  0x22   : > { %s749_s10 = scalar_select %p610_p13, 1, 0 }
  0x23   : > { %p616_p3 = por %p90_p1, %p89_p0  ;;  %p284_p4 = scmp.lt.s32.totalorder %s507_s26, 8 }
  0x24   : > { %s622_s13 = scalar_select %p43_p2, %s495_s24, %s45_s3  }
  0x25   : > { %s750_s12 = scalar_select %p616_p3, 1, 0 }
  0x26   : > { %s110_s14 = sand.u32 1, %s495_s24   ;;  %p627_p5 = pnand %p284_p4, %p592_p6 }
  0x27   : > { %s259_s16 = sshll.u32 %s110_s14, 3  ;;  %p261_p7 = scmp.ge.s32.totalorder %s507_s26, 1 }
  0x28   : > { %s268_s17 = scalar_select %p592_p6, [#allocation3], [#allocation8] }
  0x29   : > { %s269_s18 = scalar_select %p592_p6, %s503_s25, 0 }
  0x2a   : > { %s767_s17 = smov (!%p284_p4, %s268_s17), [#allocation9]  ;;  %p128_p8 = scmp.lt.s32.totalorder %s507_s26, 9 }
  0x2b   : > { %s769_s18 = smov (!%p284_p4, %s269_s18), 0  ;;  %s114_s27 = scalar_lea.vmem [#allocation4], %s259_s16 }
  0x2c   : > { %s115_s22 = sld [smem:[%s767_s17 + %s769_s18]]  ;;  %s123_s28 = sshll.u32 %s114_s27, 4  ;;  %s642_s28 = int_to_ptr.vmem [resolvable:$true] %s123_s28 }
  0x2d   : > { %p638_p10 = pnand %p261_p7, %p128_p8  ;;  %s111_s7 = scalar_lea.sflag [#allocation5], %s110_s14 }
  0x2e   : > { %p371_p11 = pneg %p627_p5  ;;  %s374_s18 = scalar_lea.hbm %s743_s1, 1024 }
  0x32   : > { %s260_s3 = sshll.u32 %s115_s22, 7 }
  0x33   : > { %s647_s4 = scalar_lea.hbm %s743_s1, %s260_s3 }
  0x34   : > { %s369_s11 = scalar_lea.hbm %s647_s4, 128  ;;  %p375_p1 = scmp.lt.u32.totalorder %s647_s4, %s743_s1 }
  0x35   : > { %p370_p6 = scmp.ne.s32.totalorder %s647_s4, %s369_s11  ;;  %p376_p2 = scmp.lt.u32.totalorder %s374_s18, %s369_s11 }
  0x36   : > { %p378_p7 = scmp.lt.u32.totalorder %s369_s11, %s647_s4 }
  0x37   : > { %p372_p12 = pnand %p371_p11, %p370_p6  ;;  %p377_p4 = por %p376_p2, %p375_p1 }
  0x39   : > { %p373_p0 = pneg %p372_p12  ;;  %p379_p8 = por %p378_p7, %p377_p4 }
  0x3b   : > { %p380_p3 = pnand %p379_p8, %p373_p0 }
  0x3d   : > { %383 = shalt.err (!%p380_p3)
}
  0x3e   : > { %s384_s14 = scalar_lea.vmem %s642_s28, 128  ;;  %s510_s3 = smov [#allocation4]  }
  0x3f   : > { %p385_p6 = scmp.ne.s32.totalorder %s642_s28, %s384_s14  ;;  %s389_s5 = sshll.u32 %s510_s3, 4  ;;  %s390_s5 = int_to_ptr.vmem [resolvable:$false] %s389_s5 }
  0x40   : > { %s391_s6 = scalar_lea.vmem %s390_s5, 256  ;;  %p392_p9 = scmp.lt.s32.totalorder %s642_s28, %s390_s5 }
  0x41   : > { %p387_p12 = pnand %p385_p6, %p371_p11  ;;  %p393_p1 = scmp.lt.s32.totalorder %s391_s6, %s384_s14 }
  0x43   : > { %p388_p13 = pneg %p387_p12  ;;  %p394_p2 = por %p393_p1, %p392_p9 }
  0x45   : > { %p395_p4 = pnand %p394_p2, %p388_p13 }
  0x47   : > { %398 = shalt.err (!%p395_p4)
}
  0x48   : > { %279 = dma.hbm_to_vmem [thread:$0]  (!%p627_p5), %s647_s4, 128, %s642_s28, %s111_s7  }
  0x49   : > { %132 = sbr.rel (%p638_p10) target bundleno = 107 (0x6b), region = 24  ;;  %s134_s11 = sand.u32 (!%p638_p10), 1, %s491_s23  }
  0x4a   : > { %s262_s16 = sshll.u32 (!%p638_p10), %s134_s11, 3  ;;  %s135_s17 = scalar_lea.sflag (!%p638_p10), [#allocation5], %s134_s11 }
  0x4b   : > { %s138_s18 = scalar_lea.vmem (!%p638_p10), [#allocation4], %s262_s16  ;;  %p753_p3 = scmp.ne.s32.totalorder (!%p638_p10), %s748_s8, 0 }
  0x50   : > { %466 = dma.done.wait (%p753_p3), %s135_s17, 128  }
  0x51   : > { %468 = vsyncadd (%p753_p3), %s135_s17, 4294967168  ;;  %s154_s15 = sand.u32 1, %s479_s20   ;;  %s265_s30 = sshll.u32 %s499_s0, 7  ;;  %v158_v0 = vld [vmem:[%s138_s18] sm:$0xff] }
  0x52   : > { %s263_s22 = sshll.u32 %s154_s15, 3  ;;  %s688_s14 = scalar_lea.hbm %s744_s2, %s265_s30 }
  0x53   : > { %s156_s28 = scalar_lea.vmem [#allocation7], %s263_s22  ;;  %s161_s8 = scalar_lea.sflag [#allocation6], %s154_s15 }
  0x54   : > { %s175_s4 = sshll.u32 %s156_s28, 4  ;;  %159 = vst [vmem:[%s156_s28] sm:$0xff] %v158_v0  ;;  %p754_p13 = scmp.ne.s32.totalorder %s749_s10, 0  ;;  %s683_s4 = int_to_ptr.vmem [resolvable:$true] %s175_s4 }
  0x55   : > { %s399_s3 = scalar_lea.vmem %s683_s4, 128  ;;  %s511_s5 = smov [#allocation7]  }
  0x56   : > { %p400_p9 = scmp.ne.s32.totalorder %s683_s4, %s399_s3  ;;  %s403_s0 = sshll.u32 %s511_s5, 4  ;;  %s404_s0 = int_to_ptr.vmem [resolvable:$false] %s403_s0 }
  0x57   : > { %s405_s6 = scalar_lea.vmem %s404_s0, 256  ;;  %p406_p11 = scmp.lt.s32.totalorder %s683_s4, %s404_s0 }
  0x58   : > { %p401_p5 = pnand %p400_p9, %p754_p13  ;;  %p407_p0 = scmp.lt.s32.totalorder %s405_s6, %s399_s3 }
  0x5a   : > { %p402_p10 = pneg %p401_p5  ;;  %p408_p7 = por %p407_p0, %p406_p11 }
  0x5c   : > { %p409_p8 = pnand %p408_p7, %p402_p10 }
  0x5e   : > { %412 = shalt.err (!%p409_p8)
}
  0x5f   : > { %s413_s11 = scalar_lea.hbm %s688_s14, 128  ;;  %s417_s18 = scalar_lea.hbm %s744_s2, 1024 }
  0x60   : > { %p414_p6 = scmp.ne.s32.totalorder %s688_s14, %s413_s11  ;;  %p418_p2 = scmp.lt.u32.totalorder %s688_s14, %s744_s2 }
  0x61   : > { %p419_p4 = scmp.lt.u32.totalorder %s417_s18, %s413_s11  ;;  %p421_p9 = scmp.lt.u32.totalorder %s413_s11, %s688_s14 }
  0x62   : > { %p415_p12 = pnand %p414_p6, %p754_p13 }
  0x63   : > { %p420_p3 = por %p419_p4, %p418_p2 }
  0x64   : > { %p416_p1 = pneg %p415_p12 }
  0x65   : > { %p422_p5 = por %p421_p9, %p420_p3 }
  0x67   : > { %p423_p10 = pnand %p422_p5, %p416_p1 }
  0x69   : > { %426 = shalt.err (!%p423_p10)
}
  0x6a   : > { %272 = dma.vmem_to_hbm [thread:$0]  (%p754_p13), %s683_s4, 128, %s688_s14, %s161_s8  }
  0x6b PF: > { %p285_p11 = scmp.ge.s32.totalorder %s507_s26, 2  ;;  %s187_s28 = sand.u32 1, %s475_s19  }
  0x6c   : > { %p755_p0 = scmp.ne.s32.totalorder %s750_s12, 0  ;;  %s188_s30 = scalar_lea.sflag [#allocation6], %s187_s28 }
  0x6e   : > { %p281_p7 = pnand %p285_p11, %p755_p0 }
  0x70   : > { %470 = dma.done.wait (!%p281_p7), %s188_s30, 128  }
  0x71   : > { %472 = vsyncadd (!%p281_p7), %s188_s30, 4294967168  ;;  %s22_s26 = sadd.s32 1, %s507_s26   ;;  %s756_s19 = smov %s479_s20 }
  0x72   : > { %p19_p8 = scmp.ge.s32.totalorder %s22_s26, 10   ;;  %s757_s20 = smov %s483_s21 }
  0x73   : > { %s758_s21 = smov %s608_s9  ;;  %s759_s22 = smov %s491_s23 }
  0x74   : > { %s760_s23 = smov %s495_s24  ;;  %s761_s24 = smov %s622_s13 }
  0x75   : > { %s762_s0 = smov %s503_s25  ;;  %s763_s25 = smov %s765_s29 }
  0x76   :  { %21 = sbr.rel (!%p19_p8) target bundleno = 20 (0x14), region = 69 }
  0x7d   :  { %193 = vsyncpa [#allocation5], 1 }
  0x7e   :  { %195 = vsyncpa [#allocation5 + $0x1], 1 }
  0x7f   :  { %196 = vsyncpa [#allocation6], 1 }
  0x80   :  { %198 = vsyncpa [#allocation6 + $0x1], 1 }

</bundles_post_ra>
